<compile_context>
chip_gen: v7x
topology: tpu7x:2x2x1
jax: 0.10.0
libtpu: 0.0.40
codegen_flags: <defaults>
</compile_context>

<pallas_src>
import jax
import jax.numpy as jnp
from jax.experimental import pallas as pl
from jax.experimental.pallas import tpu as pltpu


def mlp_value_kernel(x_ref, w1_ref, b1_ref, w2_ref, b2_ref, w3_ref, b3_ref, o_ref):
    # Hidden layer 1: Linear + ReLU (MXU matmul, f32 accumulation).
    h = jnp.dot(x_ref[...], w1_ref[...], preferred_element_type=jnp.float32)
    h = jnp.maximum(h + b1_ref[...], 0.0)

    # Hidden layer 2: Linear + ReLU.
    h = jnp.dot(h.astype(w2_ref.dtype), w2_ref[...],
                preferred_element_type=jnp.float32)
    h = jnp.maximum(h + b2_ref[...], 0.0)

    # Output head (out_dim == 1): VPU multiply + reduction instead of an N=1
    # MXU matmul. Transpose on the XLU (idle here) so the per-row scalars land
    # on the lane axis -> unmasked lane-dense (1, tb) store.
    weighted = h * w3_ref[...]                        # (tb, H2)  VPU
    wt = jnp.transpose(weighted, (1, 0))              # (H2, tb)  XLU
    o_ref[...] = jnp.sum(wt, axis=0, keepdims=True) + b3_ref[0, 0]   # (1, tb)


def _choose_tiling(batch):
    """Return (padded_batch, batch_tile).

    Small batches: one full tile (grid=(1,)), padded to a multiple of 8.
    Large batches: lane-aligned tiles (multiple of 128, up to 1024 rows) with
    at least 2 grid steps so the 'parallel' axis can shard across v7x's 2 TCs.
    VMEM is never the constraint at these widths (<~2 MiB per step).
    """
    if batch < 256:
        pb = ((batch + 7) // 8) * 8
        return pb, pb
    tb = min(1024, ((batch // 2) // 128) * 128)
    tb = max(tb, 128)
    pb = ((batch + tb - 1) // tb) * tb
    return pb, tb


def state_value_forward(states, params, *, compute_dtype=jnp.float32):
    """Fused MLP value head. states: (B, state_dim) -> (B,) f32."""
    w1, b1, w2, b2, w3, b3 = params
    B, D = states.shape
    H1 = w1.shape[1]
    H2 = w2.shape[1]

    B_pad, tb = _choose_tiling(B)
    if B_pad != B:
        states = jnp.pad(states, ((0, B_pad - B), (0, 0)))

    x = states.astype(compute_dtype)                  # bf16 halves states HBM traffic
    w1c = w1.astype(compute_dtype)
    w2c = w2.astype(compute_dtype)
    w3_row = w3.reshape(1, H2).astype(jnp.float32)    # head stays f32 on the VPU
    b3_s = b3.reshape(1, 1).astype(jnp.float32)       # single scalar -> SMEM

    out = pl.pallas_call(
        mlp_value_kernel,
        out_shape=jax.ShapeDtypeStruct((1, B_pad), jnp.float32),
        grid=(B_pad // tb,),
        in_specs=[
            pl.BlockSpec((tb, D), lambda i: (i, 0)),     # states tile
            pl.BlockSpec((D, H1), lambda i: (0, 0)),     # W1 (VMEM-resident across grid)
            pl.BlockSpec((1, H1), lambda i: (0, 0)),     # b1
            pl.BlockSpec((H1, H2), lambda i: (0, 0)),    # W2
            pl.BlockSpec((1, H2), lambda i: (0, 0)),     # b2
            pl.BlockSpec((1, H2), lambda i: (0, 0)),     # W3 as a row (VPU head)
            pl.BlockSpec(memory_space=pltpu.MemorySpace.SMEM),   # b3 scalar
        ],
        out_specs=pl.BlockSpec((1, tb), lambda i: (0, i)),   # lane-dense output slab
        compiler_params=pltpu.CompilerParams(
            dimension_semantics=("parallel",),
        ),
    )(x, w1c, b1, w2c, b2, w3_row, b3_s)

    # PyTorch: self.network(states).squeeze(-1)
    return out.reshape(-1)[:B]


def init_params(key, state_dim, mlp_widths):
    """Deterministic synthetic init (PyTorch-Linear-style uniform bounds).

    Weights stored as (in_dim, out_dim); biases as (1, out_dim).
    """
    dims = [state_dim] + list(mlp_widths) + [1]
    params = []
    for i in range(len(dims) - 1):
        key, kw, kb = jax.random.split(key, 3)
        bound = 1.0 / jnp.sqrt(dims[i])
        w = jax.random.uniform(kw, (dims[i], dims[i + 1]), jnp.float32, -bound, bound)
        b = jax.random.uniform(kb, (1, dims[i + 1]), jnp.float32, -bound, bound)
        params += [w, b]
    return tuple(params)


def reference_forward(states, params):
    w1, b1, w2, b2, w3, b3 = params
    h = jnp.maximum(states @ w1 + b1, 0.0)
    h = jnp.maximum(h @ w2 + b2, 0.0)
    return (h @ w3 + b3)[:, 0]


if __name__ == "__main__":
    key = jax.random.PRNGKey(0)
    state_dim = 16          # env.observation_space.shape[0]
    mlp_widths = [32, 32]

    key, k_states, k_params = jax.random.split(key, 3)
    params = init_params(k_params, state_dim, mlp_widths)

    # Small batch: single-tile path (grid=(1,)), f32 (bit-faithful to PyTorch).
    batch = 16
    states = jax.random.normal(k_states, (batch, state_dim), jnp.float32)
    ref = reference_forward(states, params)
    values = jax.block_until_ready(state_value_forward(states, params))
    assert values.shape == (batch,)
    assert jnp.allclose(values, ref, atol=1e-5, rtol=1e-5)

    # bf16-input path (MXU-native on v5e/v6e/v7x, f32 accumulation).
    values_bf16 = jax.block_until_ready(
        state_value_forward(states, params, compute_dtype=jnp.bfloat16))
    assert values_bf16.shape == (batch,)
    assert jnp.allclose(values_bf16, ref, atol=1e-1, rtol=1e-1)

    # Larger batch: exercises the multi-tile (grid>1, megacore-parallel) path.
    key, k_big = jax.random.split(key)
    big_batch = 384
    big_states = jax.random.normal(k_big, (big_batch, state_dim), jnp.float32)
    big_ref = reference_forward(big_states, params)
    big_values = jax.block_until_ready(state_value_forward(big_states, params))
    assert big_values.shape == (big_batch,)
    assert jnp.allclose(big_values, big_ref, atol=1e-5, rtol=1e-5)

    print("KERNEL_OK")
</pallas_src>

<mosaic_0001>
module attributes {stable_mosaic.version = 11 : i64} {
  func.func @mlp_value_kernel(%arg0: i32, %arg1: memref<16x16xf32, #tpu.memory_space<vmem>>, %arg2: memref<16x32xf32, #tpu.memory_space<vmem>>, %arg3: memref<1x32xf32, #tpu.memory_space<vmem>>, %arg4: memref<32x32xf32, #tpu.memory_space<vmem>>, %arg5: memref<1x32xf32, #tpu.memory_space<vmem>>, %arg6: memref<1x32xf32, #tpu.memory_space<vmem>>, %arg7: memref<1x1xf32, #tpu.memory_space<smem>>, %arg8: memref<1x16xf32, #tpu.memory_space<vmem>>) attributes {dimension_semantics = [#tpu.dimension_semantics<parallel>], iteration_bounds = array<i64: 1>, scalar_prefetch = 0 : i64, scratch_operands = 0 : i64, tpu.core_type = #tpu.core_type<tc>, window_params = [{transform_indices = @transform_0, window_bounds = array<i64: 16, 16>}, {pipeline_mode = #tpu.pipeline_mode<synchronous>, transform_indices = @transform_1, window_bounds = array<i64: 16, 32>}, {pipeline_mode = #tpu.pipeline_mode<synchronous>, transform_indices = @transform_2, window_bounds = array<i64: 1, 32>}, {pipeline_mode = #tpu.pipeline_mode<synchronous>, transform_indices = @transform_3, window_bounds = array<i64: 32, 32>}, {pipeline_mode = #tpu.pipeline_mode<synchronous>, transform_indices = @transform_4, window_bounds = array<i64: 1, 32>}, {pipeline_mode = #tpu.pipeline_mode<synchronous>, transform_indices = @transform_5, window_bounds = array<i64: 1, 32>}, {transform_indices = @transform_6, window_bounds = array<i64: 1, 1>}, {transform_indices = @transform_7, window_bounds = array<i64: 1, 16>}]} {
    %c0 = arith.constant 0 : index
    %c0_0 = arith.constant 0 : index
    %0 = vector.load %arg1[%c0, %c0_0] : memref<16x16xf32, #tpu.memory_space<vmem>>, vector<16x16xf32>
    %c0_1 = arith.constant 0 : index
    %c0_2 = arith.constant 0 : index
    %1 = vector.load %arg2[%c0_1, %c0_2] : memref<16x32xf32, #tpu.memory_space<vmem>>, vector<16x32xf32>
    %cst = arith.constant dense<0.000000e+00> : vector<16x32xf32>
    %2 = tpu.matmul %0, %1, %cst {dimension_numbers = #tpu.dot_dimension_numbers<[1], [0], [0], [1], [0, 0, 1, 1], [], []>} : vector<16x16xf32>, vector<16x32xf32>, vector<16x32xf32> -> vector<16x32xf32>
    %c0_3 = arith.constant 0 : index
    %c0_4 = arith.constant 0 : index
    %3 = vector.load %arg3[%c0_3, %c0_4] : memref<1x32xf32, #tpu.memory_space<vmem>>, vector<1x32xf32>
    %4 = vector.broadcast %3 : vector<1x32xf32> to vector<16x32xf32>
    %5 = arith.addf %2, %4 : vector<16x32xf32>
    %cst_5 = arith.constant 0.000000e+00 : f32
    %6 = vector.broadcast %cst_5 : f32 to vector<16x32xf32>
    %7 = arith.maximumf %5, %6 : vector<16x32xf32>
    %c0_6 = arith.constant 0 : index
    %c0_7 = arith.constant 0 : index
    %8 = vector.load %arg4[%c0_6, %c0_7] : memref<32x32xf32, #tpu.memory_space<vmem>>, vector<32x32xf32>
    %cst_8 = arith.constant dense<0.000000e+00> : vector<16x32xf32>
    %9 = tpu.matmul %7, %8, %cst_8 {dimension_numbers = #tpu.dot_dimension_numbers<[1], [0], [0], [1], [0, 0, 1, 1], [], []>} : vector<16x32xf32>, vector<32x32xf32>, vector<16x32xf32> -> vector<16x32xf32>
    %c0_9 = arith.constant 0 : index
    %c0_10 = arith.constant 0 : index
    %10 = vector.load %arg5[%c0_9, %c0_10] : memref<1x32xf32, #tpu.memory_space<vmem>>, vector<1x32xf32>
    %11 = vector.broadcast %10 : vector<1x32xf32> to vector<16x32xf32>
    %12 = arith.addf %9, %11 : vector<16x32xf32>
    %cst_11 = arith.constant 0.000000e+00 : f32
    %13 = vector.broadcast %cst_11 : f32 to vector<16x32xf32>
    %14 = arith.maximumf %12, %13 : vector<16x32xf32>
    %c0_12 = arith.constant 0 : index
    %c0_13 = arith.constant 0 : index
    %15 = vector.load %arg6[%c0_12, %c0_13] : memref<1x32xf32, #tpu.memory_space<vmem>>, vector<1x32xf32>
    %16 = vector.broadcast %15 : vector<1x32xf32> to vector<16x32xf32>
    %17 = arith.mulf %14, %16 : vector<16x32xf32>
    %18 = tpu.transpose %17, [1, 0] : vector<16x32xf32> -> vector<32x16xf32>
    %cst_14 = arith.constant dense<0.000000e+00> : vector<16xf32>
    %19 = vector.multi_reduction <add>, %18, %cst_14 [0] : vector<32x16xf32> to vector<16xf32>
    %20 = vector.shape_cast %19 : vector<16xf32> to vector<1x16xf32>
    %c0_15 = arith.constant 0 : index
    %c0_16 = arith.constant 0 : index
    %21 = memref.load %arg7[%c0_15, %c0_16] : memref<1x1xf32, #tpu.memory_space<smem>>
    %22 = vector.broadcast %21 : f32 to vector<1x16xf32>
    %23 = arith.addf %20, %22 : vector<1x16xf32>
    %c0_17 = arith.constant 0 : index
    %c0_18 = arith.constant 0 : index
    %24 = vector.load %arg8[%c0_17, %c0_18] : memref<1x16xf32, #tpu.memory_space<vmem>>, vector<1x16xf32>
    tpu.vector_store %arg8[%c0_17, %c0_18], %23 {strides = array<i32>} : memref<1x16xf32, #tpu.memory_space<vmem>>, vector<1x16xf32>,
    return
  }
  func.func @transform_0(%arg0: i32) -> (i32, i32) {
    %c0_i32 = arith.constant 0 : i32
    %c0_i32_0 = arith.constant 0 : i32
    return %arg0, %c0_i32 : i32, i32
  }
  func.func @transform_1(%arg0: i32) -> (i32, i32) {
    %c0_i32 = arith.constant 0 : i32
    %c0_i32_0 = arith.constant 0 : i32
    %c0_i32_1 = arith.constant 0 : i32
    return %c0_i32, %c0_i32_0 : i32, i32
  }
  func.func @transform_2(%arg0: i32) -> (i32, i32) {
    %c0_i32 = arith.constant 0 : i32
    %c0_i32_0 = arith.constant 0 : i32
    %c0_i32_1 = arith.constant 0 : i32
    return %c0_i32, %c0_i32_0 : i32, i32
  }
  func.func @transform_3(%arg0: i32) -> (i32, i32) {
    %c0_i32 = arith.constant 0 : i32
    %c0_i32_0 = arith.constant 0 : i32
    %c0_i32_1 = arith.constant 0 : i32
    return %c0_i32, %c0_i32_0 : i32, i32
  }
  func.func @transform_4(%arg0: i32) -> (i32, i32) {
    %c0_i32 = arith.constant 0 : i32
    %c0_i32_0 = arith.constant 0 : i32
    %c0_i32_1 = arith.constant 0 : i32
    return %c0_i32, %c0_i32_0 : i32, i32
  }
  func.func @transform_5(%arg0: i32) -> (i32, i32) {
    %c0_i32 = arith.constant 0 : i32
    %c0_i32_0 = arith.constant 0 : i32
    %c0_i32_1 = arith.constant 0 : i32
    return %c0_i32, %c0_i32_0 : i32, i32
  }
  func.func @transform_6(%arg0: i32) -> (i32, i32) {
    %c0_i32 = arith.constant 0 : i32
    %c0_i32_0 = arith.constant 0 : i32
    %c0_i32_1 = arith.constant 0 : i32
    return %c0_i32, %c0_i32_0 : i32, i32
  }
  func.func @transform_7(%arg0: i32) -> (i32, i32) {
    %c0_i32 = arith.constant 0 : i32
    %c0_i32_0 = arith.constant 0 : i32
    return %c0_i32, %arg0 : i32, i32
  }
}

</mosaic_0001>

<bundles_post_ra>
// kernel: tpu_custom_call.1
= control target key start
LH: loop header
LB: loop body
LE: loop exit
PB: predicated region body
PF: predicated region fallthrough
CT: control target
= control target key end

     0   :  { %13 = vsyncpa [#allocation4], 0  ;;  %s610_s0 = inlined_call_operand.hbm [shape: f32[16,16], index: 0, kind: input, shape index: {}]   ;;  %s611_s1 = inlined_call_operand.hbm [shape: f32[16,32], index: 1, kind: input, shape index: {}]   ;;  %s612_s2 = inlined_call_operand.vmem [shape: f32[1,32], index: 2, kind: input, shape index: {}]   ;;  %s613_s3 = inlined_call_operand.hbm [shape: f32[32,32], index: 3, kind: input, shape index: {}]   ;;  %s614_s4 = inlined_call_operand.vmem [shape: f32[1,32], index: 4, kind: input, shape index: {}]   ;;  %s615_s5 = inlined_call_operand.vmem [shape: f32[1,32], index: 5, kind: input, shape index: {}]   ;;  %s616_s6 = inlined_call_operand.<no memory space> [shape: f32[1,1], index: 6, kind: input, shape index: {}]   ;;  %s617_s7 = inlined_call_operand.hbm [shape: f32[1,16], index: 7, kind: output, shape index: {}]  }
   0x1   :  { %14 = vsyncpa [#allocation7], 0 }
   0x2   :  { %15 = vsyncpa [#allocation5], 0  ;;  %s482_s24 = smov [#allocation6]   ;;  %s483_s26 = smov [#allocation3]  }
   0x3   :  { %s33_s25 = sshll.u32 %s482_s24, 4  ;;  %s21_s27 = sshll.u32 %s483_s26, 4  ;;  %s34_s25 = int_to_ptr.vmem [resolvable:$true] %s33_s25  ;;  %s528_s27 = int_to_ptr.vmem [resolvable:$true] %s21_s27 }
   0x4   :  { %s388_s30 = scalar_lea.hbm %s611_s1, 256 }
   0x5   :  { %p389_p0 = scmp.ne.s32.totalorder %s611_s1, %s388_s30  ;;  %p392_p1 = scmp.lt.u32.totalorder %s388_s30, %s611_s1 }
   0x7   :  { %p394_p2 = pnand %p392_p1, %p389_p0 }
   0x9   :  { %397 = shalt.err (!%p394_p2)
}
   0xa   :  { %s398_s12 = scalar_lea.vmem %s34_s25, 256  ;;  %p403_p4 = scmp.lt.s32.totalorder %s34_s25, %s34_s25 }
   0xb   :  { %p399_p3 = scmp.ne.s32.totalorder %s34_s25, %s398_s12  ;;  %p404_p5 = scmp.lt.s32.totalorder %s398_s12, %s398_s12 }
   0xd   :  { %p405_p6 = por %p404_p5, %p403_p4 }
   0xf   :  { %p406_p7 = pnand %p405_p6, %p399_p3 }
  0x11   :  { %409 = shalt.err (!%p406_p7)
}
  0x12   :  { %s484_s13 = smov 128   ;;  %s485_s14 = smov 8  }
  0x13   :  { %39 = dma.hbm_to_vmem [thread:$0]  %s611_s1, 256, %s34_s25, [#allocation7], %s484_s13, %s484_s13, %s485_s14  }
  0x14   :  { %s410_s19 = scalar_lea.hbm %s610_s0, 256 }
  0x15   :  { %p411_p8 = scmp.ne.s32.totalorder %s610_s0, %s410_s19  ;;  %p414_p9 = scmp.lt.u32.totalorder %s410_s19, %s610_s0 }
  0x17   :  { %p416_p10 = pnand %p414_p9, %p411_p8 }
  0x19   :  { %419 = shalt.err (!%p416_p10)
}
  0x1a   :  { %s420_s24 = scalar_lea.vmem %s528_s27, 256  ;;  %p425_p12 = scmp.lt.s32.totalorder %s528_s27, %s528_s27 }
  0x1b   :  { %p421_p11 = scmp.ne.s32.totalorder %s528_s27, %s420_s24  ;;  %p426_p13 = scmp.lt.s32.totalorder %s420_s24, %s420_s24 }
  0x1d   :  { %p427_p0 = por %p426_p13, %p425_p12 }
  0x1f   :  { %p428_p1 = pnand %p427_p0, %p421_p11 }
  0x21   :  { %431 = shalt.err (!%p428_p1)
}
  0x22   :  { %27 = dma.hbm_to_vmem [thread:$0]  %s610_s0, 256, %s528_s27, [#allocation4], %s484_s13, %s484_s13, %s485_s14  }
  0x23   :  { %s486_s26 = smov [#allocation8]   ;;  %s432_s8 = scalar_lea.hbm %s613_s3, 512 }
  0x24   :  { %s47_s28 = sshll.u32 %s486_s26, 4  ;;  %p433_p2 = scmp.ne.s32.totalorder %s613_s3, %s432_s8  ;;  %s48_s28 = int_to_ptr.vmem [resolvable:$true] %s47_s28 }
  0x25   :  { %p436_p3 = scmp.lt.u32.totalorder %s432_s8, %s613_s3 }
  0x27   :  { %p438_p4 = pnand %p436_p3, %p433_p2 }
  0x29   :  { %441 = shalt.err (!%p438_p4)
}
  0x2a   :  { %s442_s15 = scalar_lea.vmem %s48_s28, 512  ;;  %p447_p6 = scmp.lt.s32.totalorder %s48_s28, %s48_s28 }
  0x2b   :  { %p443_p5 = scmp.ne.s32.totalorder %s48_s28, %s442_s15  ;;  %p448_p7 = scmp.lt.s32.totalorder %s442_s15, %s442_s15 }
  0x2d   :  { %p449_p8 = por %p448_p7, %p447_p6 }
  0x2f   :  { %p450_p9 = pnand %p449_p8, %p443_p5 }
  0x31   :  { %453 = shalt.err (!%p450_p9)
}
  0x32   :  { %53 = dma.hbm_to_vmem [thread:$0]  %s613_s3, 512, %s48_s28, [#allocation7], %s484_s13, %s484_s13, %s485_s14  }
  0x33   :  { %476 = dma.done.wait [#allocation4], 256  }
  0x34   :  { %477 = vsyncadd [#allocation4], 4294967040 }
  0x35   :  { %478 = dma.done.wait [#allocation7], 768  }
  0x36   :  { %479 = vsyncadd [#allocation7], 4294966528  ;;  %vm80_vm0 = vcmask 130048   ;;  %v71_v0 = vld [vmem:[#allocation6] sm:$0xff]  ;;  %v72_v1 = vld [vmem:[#allocation6 + $0x8] sm:$0xff]  ;;  %vm175_vm1 = vcmask 261120   ;;  %v314_v44 = vstv %s616_s6 }
  0x37   :  { %v69_v2 = vld [vmem:[#allocation3] sm:$0xff]  ;;  %v369_v3 = vpack.c.bf16 %v72_v1, %v71_v0  ;;  %v165_v5 = vld [vmem:[#allocation8 + $0x8] sm:$0xff]  ;;  %v166_v8 = vld [vmem:[#allocation8 + $0x10] sm:$0xff]  ;;  %vm316_vm2 = vcmask 122880  }
  0x38   :  { %355 = vmatprep.mubr.msk.f32.mxu0 %vm80_vm0, %v69_v2  ;;  %v164_v4 = vld [vmem:[#allocation8] sm:$0xff]  ;;  %v70_v7 = vld [vmem:[#allocation3 + $0x8] sm:$0xff]  ;;  %v167_v9 = vld [vmem:[#allocation8 + $0x18] sm:$0xff] }
  0x39   :  { %v373_v6 = vpack.c.bf16 %v165_v5, %v164_v4  ;;  %370 = vmatprep.subr.bf16.mxu0 %v369_v3  ;;  %v377_v10 = vpack.c.bf16 %v167_v9, %v166_v8  ;;  %v334_v11 = vld [vmem:[%s612_s2] ss:$0 sm:$0xff] }
  0x3a   :  { %372 = vmatpush3.bf16.msra.mxu0 %v369_v3  ;;  %v337_v18 = vld [vmem:[%s614_s4] ss:$0 sm:$0xff] }
  0x3b   :  { %374 = vmatprep.subr.bf16.mxu1 %v373_v6  ;;  %v340_v23 = vld [vmem:[%s615_s5] ss:$0 sm:$0xff]  ;;  %s487_s5 = smov [#allocation9]  }
  0x3c   :  { %376 = vmatpush3.bf16.msra.mxu1 %v373_v6  ;;  %s324_s19 = sshll.u32 %s487_s5, 4  ;;  %s325_s19 = int_to_ptr.vmem [resolvable:$true] %s324_s19 }
  0x3d   :  { %356 = vmatmul.mubr.msk.f32.vlgmr.msra.gmra.mrb[0].mxu0 %vm80_vm0, %v70_v7  ;;  %378 = vmatprep.subr.bf16.mxu1 %v377_v10  ;;  %s454_s20 = scalar_lea.vmem %s325_s19, 16  ;;  %s458_s21 = scalar_lea.vmem %s325_s19, 32 }
  0x3e   :  { %p455_p10 = scmp.ne.s32.totalorder %s325_s19, %s454_s20  ;;  %p459_p11 = scmp.lt.s32.totalorder %s325_s19, %s325_s19 }
  0x3f   :  { %p460_p12 = scmp.lt.s32.totalorder %s458_s21, %s454_s20 }
  0x40   :  { %380 = vmatpush3.bf16.msra.mxu1 %v377_v10 }
  0x41   :  { %p461_p13 = por %p460_p12, %p459_p11 }
  0x43   :  { %p462_p0 = pnand %p461_p13, %p455_p10 }
 0x110   :  { %v357_v12 = vpop.f32.mrb[0].mxu0 }
 0x111   :  { %v159_v13 = vadd.f32 %v357_v12, %v334_v11  ;;  %v153_v14 = vpop.f32.mrb[1].mxu0 }
 0x112   :  { %v154_v15 = vadd.f32 %v334_v11, %v153_v14 }
 0x113   :  { %v163_v17 = vmax.f32 %v159_v13, 0.0 }
 0x114   :  { %v162_v16 = vmax.f32 %v154_v15, 0.0 }
 0x116   :  { %366 = vmatprep.mubr.msk.f32.mxu1 %vm175_vm1, %v162_v16 }
 0x117   :  { %367 = vmatmul.mubr.msk.f32.vlgmr.msra.gmra.mrb[0].mxu1 %vm175_vm1, %v163_v17 }
 0x1ea   :  { %v368_v19 = vpop.f32.mrb[0].mxu1 }
 0x1eb   :  { %v248_v20 = vpop.f32.mrb[1].mxu1  ;;  %v254_v21 = vadd.f32 %v368_v19, %v337_v18 }
 0x1ec   :  { %v249_v22 = vadd.f32 %v337_v18, %v248_v20 }
 0x1ed   :  { %v258_v25 = vmax.f32 %v254_v21, 0.0 }
 0x1ee   :  { %v257_v24 = vmax.f32 %v249_v22, 0.0 }
 0x1ef   :  { %v267_v27 = vmul.f32 %v340_v23, %v258_v25 }
 0x1f0   :  { %v266_v26 = vmul.f32 %v340_v23, %v257_v24 }
 0x1f2   :  { %268 = vxpose.xlu0.b32.start [1/2] (short) (narrow) %v266_v26, 32 }
 0x1f6   :  { %269 = vxpose.xlu0.b32.end [2/2] (short) (narrow) %v267_v27, 32 }
 0x272   :  { %v284_v28 = vpop.trf.xlu0 }
 0x273   :  { %v300_v32 = vsel %vm80_vm0, %v284_v28, 0.0 }
 0x276   :  { %v285_v29 = vpop.trf.xlu0 }
 0x277   :  { %v301_v30 = vsel %vm80_vm0, %v285_v29, 0.0 }
 0x278   :  { %v302_v34 = vadd.f32 %v301_v30, %v300_v32 }
 0x27a   :  { %v286_v31 = vpop.trf.xlu0 }
 0x27b   :  { %v303_v33 = vsel %vm80_vm0, %v286_v31, 0.0 }
 0x27c   :  { %v304_v35 = vadd.f32 %v303_v33, %v302_v34 }
 0x27e   :  { %v287_v36 = vpop.trf.xlu0 }
 0x27f   :  { %v305_v37 = vsel %vm80_vm0, %v287_v36, 0.0 }
 0x280   :  { %v306_v38 = vadd.f32 %v305_v37, %v304_v35 }
 0x282   :  { %v307_v39 = vrot.slane %v306_v38, 4 }
 0x284   :  { %v308_v40 = vadd.f32 %v307_v39, %v306_v38 }
 0x286   :  { %v309_v41 = vrot.slane %v308_v40, 2 }
 0x288   :  { %v310_v42 = vadd.f32 %v309_v41, %v308_v40 }
 0x28a   :  { %v311_v43 = vrot.slane %v310_v42, 1 }
 0x28c   :  { %v312_v45 = vadd.f32 %v311_v43, %v310_v42 }
 0x28e   :  { %v315_v46 = vadd.f32 %v314_v44, %v312_v45 }
 0x290   :  { %317 = vst.msk [vmem:[#allocation9] sm:$0x1] %vm316_vm2, %v315_v46 }
 0x291   :  { %465 = shalt.err (!%p462_p0)
}
 0x292   :  { %s466_s24 = scalar_lea.hbm %s617_s7, 16 }
 0x293   :  { %p467_p1 = scmp.ne.s32.totalorder %s617_s7, %s466_s24  ;;  %p470_p2 = scmp.lt.u32.totalorder %s466_s24, %s617_s7 }
 0x295   :  { %p472_p3 = pnand %p470_p2, %p467_p1 }
 0x297   :  { %475 = shalt.err (!%p472_p3)
}
 0x298   :  { %327 = dma.vmem_to_hbm [thread:$0]  %s325_s19, 16, %s617_s7, [#allocation5]  }
 0x299   :  { %480 = dma.done.wait [#allocation5], 16  }
 0x29a   :  { %481 = vsyncadd [#allocation5], 4294967280 }
 0x29b   :  { %331 = vsyncpa [#allocation4], 1 }
 0x29c   :  { %332 = vsyncpa [#allocation7], 1 }
 0x29d   :  { %333 = vsyncpa [#allocation5], 1 }

</bundles_post_ra>
